<compile_context>
chip_gen: v5e
topology: v5e:2x2
jax: 0.10.0
libtpu: 0.0.40
codegen_flags: <defaults>
</compile_context>

<pallas_src>
import functools
import math

import numpy as np
import jax
import jax.numpy as jnp
from jax import lax
from jax.experimental import pallas as pl
from jax.experimental.pallas import tpu as pltpu


def _mid_block_kernel(xq_ref, wb1_ref, b1_ref, wb2_ref, b2_ref,
                      mask_ref, pw_ref, ph_ref, out_ref, *,
                      B, R1, R2, n_half_rows, half_row_cols, alpha):
    """conv3x3 -> lrelu -> conv3x3 -> lrelu -> avgpool2x2, whole batch at once."""
    xq = xq_ref[...]                                     # (R1 + 2, Wc*Cin)

    # ---- first conv block: PGConv(Cin -> Cin) + LeakyReLU --------------------
    # 3 banded matmuls (one per vertical tap); horizontal taps live in the K dim.
    acc1 = jnp.dot(xq[0:R1, :], wb1_ref[0], preferred_element_type=jnp.float32)
    acc1 = acc1 + jnp.dot(xq[1:R1 + 1, :], wb1_ref[1],
                          preferred_element_type=jnp.float32)
    acc1 = acc1 + jnp.dot(xq[2:R1 + 2, :], wb1_ref[2],
                          preferred_element_type=jnp.float32)
    acc1 = acc1 + b1_ref[...]                            # (1, Wh*Cin) broadcast
    # The constant mask zeroes the halo ring -> it *is* conv2's zero padding.
    h1 = jnp.where(acc1 > 0, acc1, alpha * acc1) * mask_ref[...]   # (R1, Wh*Cin)

    # ---- second conv block: PGConv(Cin -> Cout) + LeakyReLU ------------------
    acc2 = jnp.dot(h1[0:R2, :], wb2_ref[0], preferred_element_type=jnp.float32)
    acc2 = acc2 + jnp.dot(h1[1:R2 + 1, :], wb2_ref[1],
                          preferred_element_type=jnp.float32)
    acc2 = acc2 + jnp.dot(h1[2:R2 + 2, :], wb2_ref[2],
                          preferred_element_type=jnp.float32)
    acc2 = acc2 + b2_ref[...]                            # (1, W*Cout) broadcast
    h2 = jnp.where(acc2 > 0, acc2, alpha * acc2)         # (R2, W*Cout) lane-dense

    # ---- PGDownsample: 2x2 average pool, stride 2 ----------------------------
    # Done as two matmuls with constant 0/0.25 selection matrices.
    pooled = jnp.dot(ph_ref[...],
                     jnp.dot(h2, pw_ref[...], preferred_element_type=jnp.float32),
                     preferred_element_type=jnp.float32)  # (H/2*B, W/2*Cout)

    # Lay the result out as a lane-dense (B, H/2*W/2*Cout) slab.
    for yh in range(n_half_rows):
        out_ref[:, yh * half_row_cols:(yh + 1) * half_row_cols] = \
            pooled[yh * B:(yh + 1) * B, :]


def discriminator_mid_block(x_nchw, w1, b1, w2, b2, alpha=0.2):
    """x_nchw: (B, Cin, H, W) f32. Weights HWIO. Returns (B, Cout, H//2, W//2)."""
    B, Cin, H, W = x_nchw.shape
    Cout = w2.shape[-1]
    assert H % 2 == 0 and W % 2 == 0

    Rb = H + 4            # rows per batch element in packed layout (pad 2 top/bottom)
    Wc = W + 4            # source columns per row (pad 2 left/right)
    Wh = W + 2            # conv1 output columns (keeps the 1-pixel halo for conv2)
    R2 = B * Rb           # conv2 / h2 rows (batch fused on rows)
    R1 = R2 + 2           # conv1 / h1 rows
    Rx = R1 + 2           # packed input rows

    # Equalized learning rate (PGConv): both convs have fan_in = 3*3*Cin.
    scale = math.sqrt(2.0 / (3 * 3 * Cin))
    w1s = (w1 * scale).astype(jnp.float32)               # (3,3,Cin,Cin)  HWIO
    w2s = (w2 * scale).astype(jnp.float32)               # (3,3,Cin,Cout) HWIO

    # Banded (Toeplitz) weight matrices: band[dy][(s,ci),(q,co)] = w[dy, s-q, ci, co]
    # for s-q in {0,1,2}.  This folds the horizontal taps into the contraction.
    def band_selector(n_src, n_out):
        sel = np.zeros((3, n_src, n_out), np.float32)
        for dx in range(3):
            for q in range(n_out):
                s = q + dx
                if s < n_src:
                    sel[dx, s, q] = 1.0
        return jnp.asarray(sel)

    sel1 = band_selector(Wc, Wh)                          # (3, Wc, Wh)
    sel2 = band_selector(Wh, W)                           # (3, Wh, W)
    wb1 = jnp.einsum('xsq,dxio->dsiqo', sel1, w1s).reshape(3, Wc * Cin, Wh * Cin)
    wb2 = jnp.einsum('xsq,dxio->dsiqo', sel2, w2s).reshape(3, Wh * Cin, W * Cout)

    # Biases tiled along the (col, channel) lane axis.
    b1r = jnp.tile(b1.reshape(1, Cin).astype(jnp.float32), (1, Wh))   # (1, Wh*Cin)
    b2r = jnp.tile(b2.reshape(1, Cout).astype(jnp.float32), (1, W))   # (1, W*Cout)

    # Interior mask for h1: 1 on the original HxW pixels, 0 on halo ring / filler rows.
    mask = np.zeros((R1, Wh * Cin), np.float32)
    for r in range(R2):
        if 1 <= (r % Rb) <= H:
            mask[r, Cin:(W + 1) * Cin] = 1.0
    mask = jnp.asarray(mask)

    # Constant selection matrices for the 2x2/2 average pool.
    pw = np.zeros((W * Cout, (W // 2) * Cout), np.float32)
    for x in range(W):
        for c in range(Cout):
            pw[x * Cout + c, (x // 2) * Cout + c] = 1.0
    ph = np.zeros(((H // 2) * B, R2), np.float32)         # rows ordered (yh, b)
    for yh in range(H // 2):
        for b in range(B):
            ph[yh * B + b, b * Rb + 2 * yh] = 0.25
            ph[yh * B + b, b * Rb + 2 * yh + 1] = 0.25
    pw = jnp.asarray(pw)
    ph = jnp.asarray(ph)

    # Pack input: NCHW -> NHWC -> pad 2 spatially -> (batch*rows, W*Cin) + filler rows.
    x_nhwc = jnp.transpose(x_nchw, (0, 2, 3, 1)).astype(jnp.float32)
    xpad = jnp.pad(x_nhwc, ((0, 0), (2, 2), (2, 2), (0, 0)))          # (B, Rb, Wc, Cin)
    xq = xpad.reshape(B * Rb, Wc * Cin)
    xq = jnp.pad(xq, ((0, Rx - B * Rb), (0, 0)))                      # (Rx, Wc*Cin)

    out_cols = (H // 2) * (W // 2) * Cout
    kernel = functools.partial(
        _mid_block_kernel, B=B, R1=R1, R2=R2,
        n_half_rows=H // 2, half_row_cols=(W // 2) * Cout, alpha=float(alpha))

    out_flat = pl.pallas_call(
        kernel,
        out_shape=jax.ShapeDtypeStruct((B, out_cols), jnp.float32),
        grid=(1,),                                        # single step, batch fused
        in_specs=[
            pl.BlockSpec((Rx, Wc * Cin), lambda i: (0, 0)),
            pl.BlockSpec((3, Wc * Cin, Wh * Cin), lambda i: (0, 0, 0)),
            pl.BlockSpec((1, Wh * Cin), lambda i: (0, 0)),
            pl.BlockSpec((3, Wh * Cin, W * Cout), lambda i: (0, 0, 0)),
            pl.BlockSpec((1, W * Cout), lambda i: (0, 0)),
            pl.BlockSpec((R1, Wh * Cin), lambda i: (0, 0)),
            pl.BlockSpec((W * Cout, (W // 2) * Cout), lambda i: (0, 0)),
            pl.BlockSpec(((H // 2) * B, R2), lambda i: (0, 0)),
        ],
        out_specs=pl.BlockSpec((B, out_cols), lambda i: (0, 0)),
        compiler_params=pltpu.CompilerParams(
            dimension_semantics=("arbitrary",)),
    )(xq, wb1, b1r, wb2, b2r, mask, pw, ph)

    out_nhwc = out_flat.reshape(B, H // 2, W // 2, Cout)
    return jnp.transpose(out_nhwc, (0, 3, 1, 2))          # -> NCHW


def _reference(x_nchw, w1, b1, w2, b2, alpha=0.2):
    """Pure-JAX reference (NCHW activations, HWIO kernels)."""
    Cin = x_nchw.shape[1]
    ws = math.sqrt(2.0 / (3 * 3 * Cin))

    def lrelu(v):
        return jnp.where(v > 0, v, alpha * v)

    dn = lax.conv_dimension_numbers(x_nchw.shape, w1.shape, ("NCHW", "HWIO", "NCHW"))
    h = lax.conv_general_dilated(x_nchw, w1 * ws, (1, 1), ((1, 1), (1, 1)),
                                 dimension_numbers=dn)
    h = lrelu(h + b1.reshape(1, -1, 1, 1))
    dn2 = lax.conv_dimension_numbers(h.shape, w2.shape, ("NCHW", "HWIO", "NCHW"))
    h = lax.conv_general_dilated(h, w2 * ws, (1, 1), ((1, 1), (1, 1)),
                                 dimension_numbers=dn2)
    h = lrelu(h + b2.reshape(1, -1, 1, 1))
    B, C, H, W = h.shape
    h = h.reshape(B, C, H // 2, 2, W // 2, 2)
    return h.mean(axis=(3, 5))


if __name__ == "__main__":
    key = jax.random.PRNGKey(0)
    k_x, k_w1, k_w2, k_b1, k_b2 = jax.random.split(key, 5)

    # spatial_resolution=16, channel_in=4, channel_out=8, batch=2
    B, Cin, Cout, H, W = 2, 4, 8, 16, 16
    alpha = 0.2

    x = jax.random.normal(k_x, (B, Cin, H, W), dtype=jnp.float32)
    w1 = jax.random.normal(k_w1, (3, 3, Cin, Cin), dtype=jnp.float32)   # HWIO
    b1 = 0.1 * jax.random.normal(k_b1, (Cin,), dtype=jnp.float32)
    w2 = jax.random.normal(k_w2, (3, 3, Cin, Cout), dtype=jnp.float32)  # HWIO
    b2 = 0.1 * jax.random.normal(k_b2, (Cout,), dtype=jnp.float32)

    out = discriminator_mid_block(x, w1, b1, w2, b2, alpha=alpha)
    out = jax.block_until_ready(out)

    ref = jax.block_until_ready(_reference(x, w1, b1, w2, b2, alpha=alpha))
    assert out.shape == (B, Cout, H // 2, W // 2), out.shape
    err = float(jnp.abs(out - ref).max())
    assert jnp.allclose(out, ref, atol=1e-4, rtol=1e-4), err

    print("KERNEL_OK")
</pallas_src>

<mosaic_0001>
module attributes {stable_mosaic.version = 11 : i64} {
  func.func @_mid_block_kernel(%arg0: i32, %arg1: memref<44x80xf32, #tpu.memory_space<vmem>>, %arg2: memref<3x80x72xf32, #tpu.memory_space<vmem>>, %arg3: memref<1x72xf32, #tpu.memory_space<vmem>>, %arg4: memref<3x72x128xf32, #tpu.memory_space<vmem>>, %arg5: memref<1x128xf32, #tpu.memory_space<vmem>>, %arg6: memref<42x72xf32, #tpu.memory_space<vmem>>, %arg7: memref<128x64xf32, #tpu.memory_space<vmem>>, %arg8: memref<16x40xf32, #tpu.memory_space<vmem>>, %arg9: memref<2x512xf32, #tpu.memory_space<vmem>>) attributes {dimension_semantics = [#tpu.dimension_semantics<arbitrary>], iteration_bounds = array<i64: 1>, scalar_prefetch = 0 : i64, scratch_operands = 0 : i64, tpu.core_type = #tpu.core_type<tc>, window_params = [{pipeline_mode = #tpu.pipeline_mode<synchronous>, transform_indices = @transform_0, window_bounds = array<i64: 44, 80>}, {pipeline_mode = #tpu.pipeline_mode<synchronous>, transform_indices = @transform_1, window_bounds = array<i64: 3, 80, 72>}, {pipeline_mode = #tpu.pipeline_mode<synchronous>, transform_indices = @transform_2, window_bounds = array<i64: 1, 72>}, {pipeline_mode = #tpu.pipeline_mode<synchronous>, transform_indices = @transform_3, window_bounds = array<i64: 3, 72, 128>}, {pipeline_mode = #tpu.pipeline_mode<synchronous>, transform_indices = @transform_4, window_bounds = array<i64: 1, 128>}, {pipeline_mode = #tpu.pipeline_mode<synchronous>, transform_indices = @transform_5, window_bounds = array<i64: 42, 72>}, {pipeline_mode = #tpu.pipeline_mode<synchronous>, transform_indices = @transform_6, window_bounds = array<i64: 128, 64>}, {pipeline_mode = #tpu.pipeline_mode<synchronous>, transform_indices = @transform_7, window_bounds = array<i64: 16, 40>}, {pipeline_mode = #tpu.pipeline_mode<synchronous>, transform_indices = @transform_8, window_bounds = array<i64: 2, 512>}]} {
    %c0 = arith.constant 0 : index
    %c0_0 = arith.constant 0 : index
    %0 = vector.load %arg1[%c0, %c0_0] : memref<44x80xf32, #tpu.memory_space<vmem>>, vector<44x80xf32>
    %1 = vector.extract_strided_slice %0 {offsets = [0, 0], sizes = [42, 80], strides = [1, 1]} : vector<44x80xf32> to vector<42x80xf32>
    %c0_1 = arith.constant 0 : index
    %c0_2 = arith.constant 0 : index
    %c0_3 = arith.constant 0 : index
    %2 = vector.load %arg2[%c0_1, %c0_2, %c0_3] : memref<3x80x72xf32, #tpu.memory_space<vmem>>, vector<1x80x72xf32>
    %3 = vector.shape_cast %2 : vector<1x80x72xf32> to vector<80x72xf32>
    %cst = arith.constant dense<0.000000e+00> : vector<42x72xf32>
    %4 = tpu.matmul %1, %3, %cst {dimension_numbers = #tpu.dot_dimension_numbers<[1], [0], [0], [1], [0, 0, 1, 1], [], []>} : vector<42x80xf32>, vector<80x72xf32>, vector<42x72xf32> -> vector<42x72xf32>
    %5 = vector.extract_strided_slice %0 {offsets = [1, 0], sizes = [42, 80], strides = [1, 1]} : vector<44x80xf32> to vector<42x80xf32>
    %c1 = arith.constant 1 : index
    %c0_4 = arith.constant 0 : index
    %c0_5 = arith.constant 0 : index
    %6 = vector.load %arg2[%c1, %c0_4, %c0_5] : memref<3x80x72xf32, #tpu.memory_space<vmem>>, vector<1x80x72xf32>
    %7 = vector.shape_cast %6 : vector<1x80x72xf32> to vector<80x72xf32>
    %cst_6 = arith.constant dense<0.000000e+00> : vector<42x72xf32>
    %8 = tpu.matmul %5, %7, %cst_6 {dimension_numbers = #tpu.dot_dimension_numbers<[1], [0], [0], [1], [0, 0, 1, 1], [], []>} : vector<42x80xf32>, vector<80x72xf32>, vector<42x72xf32> -> vector<42x72xf32>
    %9 = arith.addf %4, %8 : vector<42x72xf32>
    %10 = vector.extract_strided_slice %0 {offsets = [2, 0], sizes = [42, 80], strides = [1, 1]} : vector<44x80xf32> to vector<42x80xf32>
    %c2 = arith.constant 2 : index
    %c0_7 = arith.constant 0 : index
    %c0_8 = arith.constant 0 : index
    %11 = vector.load %arg2[%c2, %c0_7, %c0_8] : memref<3x80x72xf32, #tpu.memory_space<vmem>>, vector<1x80x72xf32>
    %12 = vector.shape_cast %11 : vector<1x80x72xf32> to vector<80x72xf32>
    %cst_9 = arith.constant dense<0.000000e+00> : vector<42x72xf32>
    %13 = tpu.matmul %10, %12, %cst_9 {dimension_numbers = #tpu.dot_dimension_numbers<[1], [0], [0], [1], [0, 0, 1, 1], [], []>} : vector<42x80xf32>, vector<80x72xf32>, vector<42x72xf32> -> vector<42x72xf32>
    %14 = arith.addf %9, %13 : vector<42x72xf32>
    %c0_10 = arith.constant 0 : index
    %c0_11 = arith.constant 0 : index
    %15 = vector.load %arg3[%c0_10, %c0_11] : memref<1x72xf32, #tpu.memory_space<vmem>>, vector<1x72xf32>
    %16 = vector.broadcast %15 : vector<1x72xf32> to vector<42x72xf32>
    %17 = arith.addf %14, %16 : vector<42x72xf32>
    %cst_12 = arith.constant 0.000000e+00 : f32
    %18 = vector.broadcast %cst_12 : f32 to vector<42x72xf32>
    %19 = arith.cmpf ogt, %17, %18 : vector<42x72xf32>
    %cst_13 = arith.constant 2.000000e-01 : f32
    %20 = vector.broadcast %cst_13 : f32 to vector<42x72xf32>
    %21 = arith.mulf %20, %17 : vector<42x72xf32>
    %22 = arith.select %19, %17, %21 : vector<42x72xi1>, vector<42x72xf32>
    %c0_14 = arith.constant 0 : index
    %c0_15 = arith.constant 0 : index
    %23 = vector.load %arg6[%c0_14, %c0_15] : memref<42x72xf32, #tpu.memory_space<vmem>>, vector<42x72xf32>
    %24 = arith.mulf %22, %23 : vector<42x72xf32>
    %25 = vector.extract_strided_slice %24 {offsets = [0, 0], sizes = [40, 72], strides = [1, 1]} : vector<42x72xf32> to vector<40x72xf32>
    %c0_16 = arith.constant 0 : index
    %c0_17 = arith.constant 0 : index
    %c0_18 = arith.constant 0 : index
    %26 = vector.load %arg4[%c0_16, %c0_17, %c0_18] : memref<3x72x128xf32, #tpu.memory_space<vmem>>, vector<1x72x128xf32>
    %27 = vector.shape_cast %26 : vector<1x72x128xf32> to vector<72x128xf32>
    %cst_19 = arith.constant dense<0.000000e+00> : vector<40x128xf32>
    %28 = tpu.matmul %25, %27, %cst_19 {dimension_numbers = #tpu.dot_dimension_numbers<[1], [0], [0], [1], [0, 0, 1, 1], [], []>} : vector<40x72xf32>, vector<72x128xf32>, vector<40x128xf32> -> vector<40x128xf32>
    %29 = vector.extract_strided_slice %24 {offsets = [1, 0], sizes = [40, 72], strides = [1, 1]} : vector<42x72xf32> to vector<40x72xf32>
    %c1_20 = arith.constant 1 : index
    %c0_21 = arith.constant 0 : index
    %c0_22 = arith.constant 0 : index
    %30 = vector.load %arg4[%c1_20, %c0_21, %c0_22] : memref<3x72x128xf32, #tpu.memory_space<vmem>>, vector<1x72x128xf32>
    %31 = vector.shape_cast %30 : vector<1x72x128xf32> to vector<72x128xf32>
    %cst_23 = arith.constant dense<0.000000e+00> : vector<40x128xf32>
    %32 = tpu.matmul %29, %31, %cst_23 {dimension_numbers = #tpu.dot_dimension_numbers<[1], [0], [0], [1], [0, 0, 1, 1], [], []>} : vector<40x72xf32>, vector<72x128xf32>, vector<40x128xf32> -> vector<40x128xf32>
    %33 = arith.addf %28, %32 : vector<40x128xf32>
    %34 = vector.extract_strided_slice %24 {offsets = [2, 0], sizes = [40, 72], strides = [1, 1]} : vector<42x72xf32> to vector<40x72xf32>
    %c2_24 = arith.constant 2 : index
    %c0_25 = arith.constant 0 : index
    %c0_26 = arith.constant 0 : index
    %35 = vector.load %arg4[%c2_24, %c0_25, %c0_26] : memref<3x72x128xf32, #tpu.memory_space<vmem>>, vector<1x72x128xf32>
    %36 = vector.shape_cast %35 : vector<1x72x128xf32> to vector<72x128xf32>
    %cst_27 = arith.constant dense<0.000000e+00> : vector<40x128xf32>
    %37 = tpu.matmul %34, %36, %cst_27 {dimension_numbers = #tpu.dot_dimension_numbers<[1], [0], [0], [1], [0, 0, 1, 1], [], []>} : vector<40x72xf32>, vector<72x128xf32>, vector<40x128xf32> -> vector<40x128xf32>
    %38 = arith.addf %33, %37 : vector<40x128xf32>
    %c0_28 = arith.constant 0 : index
    %c0_29 = arith.constant 0 : index
    %39 = vector.load %arg5[%c0_28, %c0_29] : memref<1x128xf32, #tpu.memory_space<vmem>>, vector<1x128xf32>
    %40 = vector.broadcast %39 : vector<1x128xf32> to vector<40x128xf32>
    %41 = arith.addf %38, %40 : vector<40x128xf32>
    %cst_30 = arith.constant 0.000000e+00 : f32
    %42 = vector.broadcast %cst_30 : f32 to vector<40x128xf32>
    %43 = arith.cmpf ogt, %41, %42 : vector<40x128xf32>
    %cst_31 = arith.constant 2.000000e-01 : f32
    %44 = vector.broadcast %cst_31 : f32 to vector<40x128xf32>
    %45 = arith.mulf %44, %41 : vector<40x128xf32>
    %46 = arith.select %43, %41, %45 : vector<40x128xi1>, vector<40x128xf32>
    %c0_32 = arith.constant 0 : index
    %c0_33 = arith.constant 0 : index
    %47 = vector.load %arg8[%c0_32, %c0_33] : memref<16x40xf32, #tpu.memory_space<vmem>>, vector<16x40xf32>
    %c0_34 = arith.constant 0 : index
    %c0_35 = arith.constant 0 : index
    %48 = vector.load %arg7[%c0_34, %c0_35] : memref<128x64xf32, #tpu.memory_space<vmem>>, vector<128x64xf32>
    %cst_36 = arith.constant dense<0.000000e+00> : vector<40x64xf32>
    %49 = tpu.matmul %46, %48, %cst_36 {dimension_numbers = #tpu.dot_dimension_numbers<[1], [0], [0], [1], [0, 0, 1, 1], [], []>} : vector<40x128xf32>, vector<128x64xf32>, vector<40x64xf32> -> vector<40x64xf32>
    %cst_37 = arith.constant dense<0.000000e+00> : vector<16x64xf32>
    %50 = tpu.matmul %47, %49, %cst_37 {dimension_numbers = #tpu.dot_dimension_numbers<[1], [0], [0], [1], [0, 0, 1, 1], [], []>} : vector<16x40xf32>, vector<40x64xf32>, vector<16x64xf32> -> vector<16x64xf32>
    %51 = vector.extract_strided_slice %50 {offsets = [0, 0], sizes = [2, 64], strides = [1, 1]} : vector<16x64xf32> to vector<2x64xf32>
    %c0_38 = arith.constant 0 : index
    %c0_39 = arith.constant 0 : index
    %52 = vector.load %arg9[%c0_38, %c0_39] : memref<2x512xf32, #tpu.memory_space<vmem>>, vector<2x64xf32>
    tpu.vector_store %arg9[%c0_38, %c0_39], %51 {strides = array<i32>} : memref<2x512xf32, #tpu.memory_space<vmem>>, vector<2x64xf32>,
    %53 = vector.extract_strided_slice %50 {offsets = [2, 0], sizes = [2, 64], strides = [1, 1]} : vector<16x64xf32> to vector<2x64xf32>
    %c0_40 = arith.constant 0 : index
    %c64 = arith.constant 64 : index
    %54 = vector.load %arg9[%c0_40, %c64] : memref<2x512xf32, #tpu.memory_space<vmem>>, vector<2x64xf32>
    tpu.vector_store %arg9[%c0_40, %c64], %53 {strides = array<i32>} : memref<2x512xf32, #tpu.memory_space<vmem>>, vector<2x64xf32>,
    %55 = vector.extract_strided_slice %50 {offsets = [4, 0], sizes = [2, 64], strides = [1, 1]} : vector<16x64xf32> to vector<2x64xf32>
    %c0_41 = arith.constant 0 : index
    %c128 = arith.constant 128 : index
    %56 = vector.load %arg9[%c0_41, %c128] : memref<2x512xf32, #tpu.memory_space<vmem>>, vector<2x64xf32>
    tpu.vector_store %arg9[%c0_41, %c128], %55 {strides = array<i32>} : memref<2x512xf32, #tpu.memory_space<vmem>>, vector<2x64xf32>,
    %57 = vector.extract_strided_slice %50 {offsets = [6, 0], sizes = [2, 64], strides = [1, 1]} : vector<16x64xf32> to vector<2x64xf32>
    %c0_42 = arith.constant 0 : index
    %c192 = arith.constant 192 : index
    %58 = vector.load %arg9[%c0_42, %c192] : memref<2x512xf32, #tpu.memory_space<vmem>>, vector<2x64xf32>
    tpu.vector_store %arg9[%c0_42, %c192], %57 {strides = array<i32>} : memref<2x512xf32, #tpu.memory_space<vmem>>, vector<2x64xf32>,
    %59 = vector.extract_strided_slice %50 {offsets = [8, 0], sizes = [2, 64], strides = [1, 1]} : vector<16x64xf32> to vector<2x64xf32>
    %c0_43 = arith.constant 0 : index
    %c256 = arith.constant 256 : index
    %60 = vector.load %arg9[%c0_43, %c256] : memref<2x512xf32, #tpu.memory_space<vmem>>, vector<2x64xf32>
    tpu.vector_store %arg9[%c0_43, %c256], %59 {strides = array<i32>} : memref<2x512xf32, #tpu.memory_space<vmem>>, vector<2x64xf32>,
    %61 = vector.extract_strided_slice %50 {offsets = [10, 0], sizes = [2, 64], strides = [1, 1]} : vector<16x64xf32> to vector<2x64xf32>
    %c0_44 = arith.constant 0 : index
    %c320 = arith.constant 320 : index
    %62 = vector.load %arg9[%c0_44, %c320] : memref<2x512xf32, #tpu.memory_space<vmem>>, vector<2x64xf32>
    tpu.vector_store %arg9[%c0_44, %c320], %61 {strides = array<i32>} : memref<2x512xf32, #tpu.memory_space<vmem>>, vector<2x64xf32>,
    %63 = vector.extract_strided_slice %50 {offsets = [12, 0], sizes = [2, 64], strides = [1, 1]} : vector<16x64xf32> to vector<2x64xf32>
    %c0_45 = arith.constant 0 : index
    %c384 = arith.constant 384 : index
    %64 = vector.load %arg9[%c0_45, %c384] : memref<2x512xf32, #tpu.memory_space<vmem>>, vector<2x64xf32>
    tpu.vector_store %arg9[%c0_45, %c384], %63 {strides = array<i32>} : memref<2x512xf32, #tpu.memory_space<vmem>>, vector<2x64xf32>,
    %65 = vector.extract_strided_slice %50 {offsets = [14, 0], sizes = [2, 64], strides = [1, 1]} : vector<16x64xf32> to vector<2x64xf32>
    %c0_46 = arith.constant 0 : index
    %c448 = arith.constant 448 : index
    %66 = vector.load %arg9[%c0_46, %c448] : memref<2x512xf32, #tpu.memory_space<vmem>>, vector<2x64xf32>
    tpu.vector_store %arg9[%c0_46, %c448], %65 {strides = array<i32>} : memref<2x512xf32, #tpu.memory_space<vmem>>, vector<2x64xf32>,
    return
  }
  func.func @transform_0(%arg0: i32) -> (i32, i32) {
    %c0_i32 = arith.constant 0 : i32
    %c0_i32_0 = arith.constant 0 : i32
    %c0_i32_1 = arith.constant 0 : i32
    return %c0_i32, %c0_i32_0 : i32, i32
  }
  func.func @transform_1(%arg0: i32) -> (i32, i32, i32) {
    %c0_i32 = arith.constant 0 : i32
    %c0_i32_0 = arith.constant 0 : i32
    %c0_i32_1 = arith.constant 0 : i32
    %c0_i32_2 = arith.constant 0 : i32
    return %c0_i32, %c0_i32_0, %c0_i32_1 : i32, i32, i32
  }
  func.func @transform_2(%arg0: i32) -> (i32, i32) {
    %c0_i32 = arith.constant 0 : i32
    %c0_i32_0 = arith.constant 0 : i32
    %c0_i32_1 = arith.constant 0 : i32
    return %c0_i32, %c0_i32_0 : i32, i32
  }
  func.func @transform_3(%arg0: i32) -> (i32, i32, i32) {
    %c0_i32 = arith.constant 0 : i32
    %c0_i32_0 = arith.constant 0 : i32
    %c0_i32_1 = arith.constant 0 : i32
    %c0_i32_2 = arith.constant 0 : i32
    return %c0_i32, %c0_i32_0, %c0_i32_1 : i32, i32, i32
  }
  func.func @transform_4(%arg0: i32) -> (i32, i32) {
    %c0_i32 = arith.constant 0 : i32
    %c0_i32_0 = arith.constant 0 : i32
    %c0_i32_1 = arith.constant 0 : i32
    return %c0_i32, %c0_i32_0 : i32, i32
  }
  func.func @transform_5(%arg0: i32) -> (i32, i32) {
    %c0_i32 = arith.constant 0 : i32
    %c0_i32_0 = arith.constant 0 : i32
    %c0_i32_1 = arith.constant 0 : i32
    return %c0_i32, %c0_i32_0 : i32, i32
  }
  func.func @transform_6(%arg0: i32) -> (i32, i32) {
    %c0_i32 = arith.constant 0 : i32
    %c0_i32_0 = arith.constant 0 : i32
    %c0_i32_1 = arith.constant 0 : i32
    return %c0_i32, %c0_i32_0 : i32, i32
  }
  func.func @transform_7(%arg0: i32) -> (i32, i32) {
    %c0_i32 = arith.constant 0 : i32
    %c0_i32_0 = arith.constant 0 : i32
    %c0_i32_1 = arith.constant 0 : i32
    return %c0_i32, %c0_i32_0 : i32, i32
  }
  func.func @transform_8(%arg0: i32) -> (i32, i32) {
    %c0_i32 = arith.constant 0 : i32
    %c0_i32_0 = arith.constant 0 : i32
    %c0_i32_1 = arith.constant 0 : i32
    return %c0_i32, %c0_i32_0 : i32, i32
  }
}

</mosaic_0001>

<bundles_post_ra>
// kernel: tpu_custom_call.1
= control target key start
LH: loop header
LB: loop body
LE: loop exit
PB: predicated region body
PF: predicated region fallthrough
CT: control target
= control target key end

     0   :  { %s1134_s0 = inlined_call_operand.vmem [shape: f32[44,80], index: 0, kind: input, shape index: {}]   ;;  %s1135_s1 = inlined_call_operand.vmem [shape: f32[3,80,72], index: 1, kind: input, shape index: {}]   ;;  %s1136_s2 = inlined_call_operand.vmem [shape: f32[1,72], index: 2, kind: input, shape index: {}]   ;;  %s1137_s3 = inlined_call_operand.vmem [shape: f32[3,72,128], index: 3, kind: input, shape index: {}]   ;;  %s1138_s4 = inlined_call_operand.vmem [shape: f32[1,128], index: 4, kind: input, shape index: {}]   ;;  %s1139_s5 = inlined_call_operand.vmem [shape: f32[42,72], index: 5, kind: input, shape index: {}]   ;;  %s1140_s6 = inlined_call_operand.vmem [shape: f32[128,64], index: 6, kind: input, shape index: {}]   ;;  %s1141_s7 = inlined_call_operand.vmem [shape: f32[16,40], index: 7, kind: input, shape index: {}]   ;;  %s1142_s8 = inlined_call_operand.hbm [shape: f32[2,512], index: 8, kind: output, shape index: {}]  }
   0x1   :  { %v670_v0 = vld [vmem:[%s1135_s1 + $0xe8] sm:$0xff]  ;;  %v669_v1 = vld [vmem:[%s1135_s1 + $0xe0] sm:$0xff]  ;;  %v648_v2 = vld [vmem:[%s1135_s1 + $0x98] sm:$0xff] }
   0x2   :  { %211 = vmatpush.msra.mxu2 %v670_v0  ;;  %94 = vmatpush.msra.mxu0 %v648_v2  ;;  %v45_v3 = vld [vmem:[%s1135_s1 + $0x48] sm:$0xff]  ;;  %v647_v4 = vld [vmem:[%s1135_s1 + $0x90] sm:$0xff]  ;;  %v668_v5 = vld [vmem:[%s1135_s1 + $0xd8] sm:$0xff] }
   0x3   :  { %141 = vmatpush.msra.mxu1 %v45_v3  ;;  %v44_v6 = vld [vmem:[%s1135_s1 + $0x40] sm:$0xff]  ;;  %v646_v7 = vld [vmem:[%s1135_s1 + $0x88] sm:$0xff]  ;;  %v43_v8 = vld [vmem:[%s1135_s1 + $0x38] sm:$0xff] }
   0x4   :  { %212 = vmatpush.msra.mxu2 %v669_v1  ;;  %95 = vmatpush.msra.mxu0 %v647_v4  ;;  %v667_v9 = vld [vmem:[%s1135_s1 + $0xd0] sm:$0xff]  ;;  %v645_v10 = vld [vmem:[%s1135_s1 + $0x80] sm:$0xff]  ;;  %v666_v12 = vld [vmem:[%s1135_s1 + $0xc8] sm:$0xff] }
   0x5   :  { %142 = vmatpush.msra.mxu1 %v44_v6  ;;  %v42_v11 = vld [vmem:[%s1135_s1 + $0x30] sm:$0xff]  ;;  %v644_v13 = vld [vmem:[%s1135_s1 + $0x78] sm:$0xff]  ;;  %v41_v14 = vld [vmem:[%s1135_s1 + $0x28] sm:$0xff] }
   0x6   :  { %213 = vmatpush.msra.mxu2 %v668_v5  ;;  %96 = vmatpush.msra.mxu0 %v646_v7  ;;  %v665_v15 = vld [vmem:[%s1135_s1 + $0xc0] sm:$0xff]  ;;  %v643_v16 = vld [vmem:[%s1135_s1 + $0x70] sm:$0xff]  ;;  %v664_v17 = vld [vmem:[%s1135_s1 + $0xb8] sm:$0xff] }
   0x7   :  { %143 = vmatpush.msra.mxu1 %v43_v8  ;;  %v40_v18 = vld [vmem:[%s1135_s1 + $0x20] sm:$0xff]  ;;  %v642_v19 = vld [vmem:[%s1135_s1 + $0x68] sm:$0xff]  ;;  %v663_v22 = vld [vmem:[%s1135_s1 + $0xb0] sm:$0xff] }
   0x8   :  { %214 = vmatpush.msra.mxu2 %v667_v9  ;;  %97 = vmatpush.msra.mxu0 %v645_v10  ;;  %v30_v20 = vld [vmem:[%s1134_s0] sm:$0xff]  ;;  %v31_v21 = vld [vmem:[%s1134_s0 + $0x8] sm:$0xff]  ;;  %v39_v23 = vld [vmem:[%s1135_s1 + $0x18] sm:$0xff] }
   0x9   :  { %144 = vmatpush.msra.mxu1 %v42_v11  ;;  %v641_v24 = vld [vmem:[%s1135_s1 + $0x60] sm:$0xff] }
   0xa   :  { %215 = vmatpush.msra.mxu2 %v666_v12  ;;  %98 = vmatpush.msra.mxu0 %v644_v13 }
   0xb   :  { %145 = vmatpush.msra.mxu1 %v41_v14 }
   0xc   :  { %216 = vmatpush.msra.mxu2 %v665_v15  ;;  %99 = vmatpush.msra.mxu0 %v643_v16 }
   0xd   :  { %146 = vmatpush.msra.mxu1 %v40_v18 }
   0xe   :  { %13 = vsyncpa [#allocation3], 0  ;;  %217 = vmatpush.msra.mxu2 %v664_v17  ;;  %100 = vmatpush.msra.mxu0 %v642_v19  ;;  %v38_v25 = vld [vmem:[%s1135_s1 + $0x10] sm:$0xff]  ;;  %v182_v26 = vrot.slane %v30_v20, 2  ;;  %v183_v27 = vrot.slane %v31_v21, 2  ;;  %v662_v28 = vld [vmem:[%s1135_s1 + $0xa8] sm:$0xff] }
   0xf   :  { %147 = vmatpush.msra.mxu1 %v39_v23  ;;  %vm181_vm0 = vcmask 1045504   ;;  %v640_v29 = vld [vmem:[%s1135_s1 + $0x58] sm:$0xff]  ;;  %v64_v30 = vrot.slane %v30_v20, 1  ;;  %v65_v31 = vrot.slane %v31_v21, 1  ;;  %v37_v32 = vld [vmem:[%s1135_s1 + $0x8] sm:$0xff]  ;;  %vm63_vm1 = vcmask 1046528  }
  0x10   :  { %218 = vmatpush.msra.mxu2 %v663_v22  ;;  %101 = vmatpush.msra.mxu0 %v641_v24  ;;  %v661_v33 = vld [vmem:[%s1135_s1 + $0xa0] sm:$0xff]  ;;  %v639_v34 = vld [vmem:[%s1135_s1 + $0x50] sm:$0xff]  ;;  %vm75_vm2 = vcmask 654336   ;;  %v184_v35 = vsel %vm181_vm0, %v182_v26, %v183_v27  ;;  %v33_v43 = vld [vmem:[%s1134_s0 + $0x18] sm:$0xff]  ;;  %vm322_vm5 = vcmask 588800   ;;  %vm549_vm15 = vcmask 326656  }
  0x11   :  { %148 = vmatpush.msra.mxu1 %v38_v25  ;;  %v36_v36 = vld [vmem:[%s1135_s1] sm:$0xff]  ;;  %v66_v37 = vsel %vm63_vm1, %v64_v30, %v65_v31  ;;  %v32_v38 = vld [vmem:[%s1134_s0 + $0x10] sm:$0xff]  ;;  %v187_v44 = vrot.slane %v33_v43, 2  ;;  %v69_v45 = vrot.slane %v33_v43, 1  ;;  %v35_v53 = vld [vmem:[%s1134_s0 + $0x28] sm:$0xf] }
  0x12   :  { %219 = vmatpush.msra.mxu2 %v662_v28  ;;  %102 = vmatpush.msra.mxu0 %v640_v29  ;;  %v185_v39 = vrot.slane %v32_v38, 2  ;;  %v67_v40 = vrot.slane %v32_v38, 1  ;;  %v34_v48 = vld [vmem:[%s1134_s0 + $0x20] sm:$0xff]  ;;  %v191_v54 = vrot.slane %v35_v53, 2  ;;  %v73_v55 = vrot.slane %v35_v53, 1  ;;  %v685_v58 = vld [vmem:[%s1137_s3 + $0x88] sm:$0xff] }
  0x13   :  { %149 = vmatpush.msra.mxu1 %v37_v32  ;;  %v189_v49 = vrot.slane %v34_v48, 2  ;;  %v71_v50 = vrot.slane %v34_v48, 1  ;;  %v704_v59 = vld [vmem:[%s1137_s3 + $0xd0] sm:$0xff]  ;;  %340 = vmatpush.msra.mxu3 %v685_v58  ;;  %v684_v60 = vld [vmem:[%s1137_s3 + $0x80] sm:$0xff]  ;;  %v703_v61 = vld [vmem:[%s1137_s3 + $0xc8] sm:$0xff]  ;;  %s742_s10 = smov 64  }
  0x14   :  { %220 = vmatpush.msra.mxu2 %v661_v33  ;;  %103 = vmatpush.msra.mxu0 %v639_v34  ;;  %v186_v41 = vsel %vm181_vm0, %v183_v27, %v185_v39  ;;  %v68_v42 = vsel %vm63_vm1, %v65_v31, %v67_v40  ;;  %v188_v46 = vsel %vm181_vm0, %v185_v39, %v187_v44  ;;  %v683_v62 = vld [vmem:[%s1137_s3 + $0x78] sm:$0xff]  ;;  %v702_v63 = vld [vmem:[%s1137_s3 + $0xc0] sm:$0xff]  ;;  %v682_v0 = vld [vmem:[%s1137_s3 + $0x70] sm:$0xff]  ;;  %s630_s14 = sshll.u32 %s1142_s8, 4  ;;  %s631_s14 = int_to_ptr.hbm [resolvable:$true] %s630_s14 }
  0x15   :  { %671 = vmatmul.msk.f32.vlgmr.msra.gmra.mxu2 %vm75_vm2, %v184_v35  ;;  %150 = vmatpush.msra.mxu1 %v36_v36  ;;  %v70_v47 = vsel %vm63_vm1, %v67_v40, %v69_v45  ;;  %v190_v51 = vsel %vm181_vm0, %v187_v44, %v189_v49  ;;  %v72_v52 = vsel %vm63_vm1, %v69_v45, %v71_v50  ;;  %v701_v1 = vld [vmem:[%s1137_s3 + $0xb8] sm:$0xff]  ;;  %v681_v2 = vld [vmem:[%s1137_s3 + $0x68] sm:$0xff]  ;;  %v700_v3 = vld [vmem:[%s1137_s3 + $0xb0] sm:$0xff] }
  0x16   :  { %649 = vmatmul.msk.f32.vlgmr.msra.gmra.mxu0 %vm75_vm2, %v66_v37  ;;  %655 = vmatmul.msk.f32.vlgmr.msra.gmra.mxu1 %vm75_vm2, %v30_v20  ;;  %v192_v56 = vsel %vm181_vm0, %v189_v49, %v191_v54  ;;  %v74_v57 = vsel %vm63_vm1, %v71_v50, %v73_v55  ;;  %v680_v4 = vld [vmem:[%s1137_s3 + $0x60] sm:$0xff]  ;;  %v699_v5 = vld [vmem:[%s1137_s3 + $0xa8] sm:$0xff]  ;;  %v679_v6 = vld [vmem:[%s1137_s3 + $0x58] sm:$0xff] }
  0x17   :  { %445 = vmatpush.msrb.mxu0 %v704_v59  ;;  %341 = vmatpush.msra.mxu3 %v684_v60  ;;  %v698_v7 = vld [vmem:[%s1137_s3 + $0xa0] sm:$0xff]  ;;  %v678_v8 = vld [vmem:[%s1137_s3 + $0x50] sm:$0xff]  ;;  %v697_v9 = vld [vmem:[%s1137_s3 + $0x98] sm:$0xff] }
  0x18   :  { %v677_v10 = vld [vmem:[%s1137_s3 + $0x48] sm:$0xff]  ;;  %v696_v11 = vld [vmem:[%s1137_s3 + $0x90] sm:$0xff]  ;;  %v982_v15 = vld [vmem:[%s1136_s2] ss:$0 sm:$0xff] }
  0x19   :  { %446 = vmatpush.msrb.mxu0 %v703_v61  ;;  %342 = vmatpush.msra.mxu3 %v683_v62  ;;  %v274_v26 = vld [vmem:[%s1139_s5] sm:$0xff]  ;;  %v275_v32 = vld [vmem:[%s1139_s5 + $0x8] sm:$0xff]  ;;  %v293_v34 = vld [vmem:[%s1137_s3 + $0x38] sm:$0xff] }
  0x1a   :  { %v294_v30 = vld [vmem:[%s1137_s3 + $0x40] sm:$0xff]  ;;  %v292_v37 = vld [vmem:[%s1137_s3 + $0x30] sm:$0xff]  ;;  %v291_v40 = vld [vmem:[%s1137_s3 + $0x28] sm:$0xff] }
  0x1b   :  { %447 = vmatpush.msrb.mxu0 %v702_v63  ;;  %343 = vmatpush.msra.mxu3 %v682_v0  ;;  %v287_v58 = vld [vmem:[%s1137_s3 + $0x8] sm:$0xff]  ;;  %v286_v62 = vld [vmem:[%s1137_s3] sm:$0xff] }
  0x1d   :  { %672 = vmatmul.msk.f32.gmra.mxu2 %vm75_vm2, %v186_v41  ;;  %448 = vmatpush.msrb.mxu0 %v701_v1 }
  0x1e   :  { %650 = vmatmul.msk.f32.gmra.mxu0 %vm75_vm2, %v68_v42  ;;  %656 = vmatmul.msk.f32.gmra.mxu1 %vm75_vm2, %v31_v21  ;;  %v290_v42 = vld [vmem:[%s1137_s3 + $0x20] sm:$0xff] }
  0x1f   :  { %344 = vmatpush.msra.mxu3 %v681_v2  ;;  %449 = vmatpush.msrb.mxu0 %v700_v3 }
  0x21   :  { %345 = vmatpush.msra.mxu3 %v680_v4  ;;  %450 = vmatpush.msrb.mxu0 %v699_v5 }
  0x23   :  { %346 = vmatpush.msra.mxu3 %v679_v6  ;;  %451 = vmatpush.msrb.mxu0 %v698_v7  ;;  %v277_v7 = vld [vmem:[%s1139_s5 + $0x18] sm:$0xff] }
  0x25   :  { %673 = vmatmul.msk.f32.gmra.mxu2 %vm75_vm2, %v188_v46  ;;  %347 = vmatpush.msra.mxu3 %v678_v8 }
  0x26   :  { %651 = vmatmul.msk.f32.gmra.mxu0 %vm75_vm2, %v70_v47  ;;  %657 = vmatmul.msk.f32.gmra.mxu1 %vm75_vm2, %v32_v38 }
  0x27   :  { %452 = vmatpush.msrb.mxu0 %v697_v9  ;;  %348 = vmatpush.msra.mxu3 %v677_v10 }
  0x29   :  { %453 = vmatpush.msrb.mxu0 %v696_v11  ;;  %382 = vmatpush.msrb.mxu3 %v294_v30 }
  0x2b   :  { %383 = vmatpush.msrb.mxu3 %v293_v34  ;;  %v279_v34 = vld [vmem:[%s1139_s5 + $0x28] sm:$0x3] }
  0x2d   :  { %674 = vmatmul.msk.f32.gmra.mxu2 %vm75_vm2, %v190_v51  ;;  %384 = vmatpush.msrb.mxu3 %v292_v37 }
  0x2e   :  { %652 = vmatmul.msk.f32.gmra.mxu0 %vm75_vm2, %v72_v52  ;;  %658 = vmatmul.msk.f32.gmra.mxu1 %vm75_vm2, %v33_v43 }
  0x2f   :  { %385 = vmatpush.msrb.mxu3 %v291_v40 }
  0x31   :  { %386 = vmatpush.msrb.mxu3 %v290_v42  ;;  %v516_v42 = vld [vmem:[%s1140_s6 + $0x78] sm:$0xff] }
  0x32   :  { %517 = vmatpush.msrb.mxu1 %v516_v42 }
  0x35   :  { %675 = vmatmul.msk.f32.gmra.mxu2 %vm75_vm2, %v192_v56  ;;  %v288_v56 = vld [vmem:[%s1137_s3 + $0x10] sm:$0xff] }
  0x36   :  { %653 = vmatmul.msk.f32.gmra.mxu0 %vm75_vm2, %v74_v57  ;;  %659 = vmatmul.msk.f32.gmra.mxu1 %vm75_vm2, %v34_v48 }
  0x3d   :  { %676 = vmatmul.msk.f32.gmra.mxu2 %vm75_vm2, %v191_v54 }
  0x3e   :  { %654 = vmatmul.msk.f32.gmra.mxu0 %vm75_vm2, %v73_v55  ;;  %660 = vmatmul.msk.f32.gmra.mxu1 %vm75_vm2, %v35_v53  ;;  %v276_v53 = vld [vmem:[%s1139_s5 + $0x10] sm:$0xff]  ;;  %v289_v55 = vld [vmem:[%s1137_s3 + $0x18] sm:$0xff] }
  0x3f   :  { %387 = vmatpush.msrb.mxu3 %v289_v55  ;;  %v503_v55 = vld [vmem:[%s1140_s6 + $0x10] sm:$0xff] }
  0x41   :  { %388 = vmatpush.msrb.mxu3 %v288_v56  ;;  %v502_v56 = vld [vmem:[%s1140_s6 + $0x8] sm:$0xff] }
  0x43   :  { %389 = vmatpush.msrb.mxu3 %v287_v58  ;;  %v501_v58 = vld [vmem:[%s1140_s6] sm:$0xff] }
  0x45   :  { %390 = vmatpush.msrb.mxu3 %v286_v62 }
  0x93   :  { %v105_v12 = vpop.f32.mrf.mxu0  ;;  %v152_v13 = vpop.f32.mrf.mxu1 }
  0x94   :  { %v153_v14 = vadd.f32 %v152_v13, %v105_v12 }
  0x98   :  { %v222_v16 = vpop.f32.mrf.mxu2 }
  0x99   :  { %v240_v17 = vadd.f32 %v222_v16, %v153_v14 }
  0x9b   :  { %v250_v18 = vadd.f32 %v982_v15, %v240_v17  ;;  %v108_v19 = vpop.f32.mrf.mxu0  ;;  %v155_v20 = vpop.f32.mrf.mxu1 }
  0x9c   :  { %v156_v21 = vadd.f32 %v155_v20, %v108_v19 }
  0x9d   :  { %v262_v22 = vmul.f32 0.2, %v250_v18  ;;  %vm256_vm3 = vcmp.gt.f32.partialorder %v250_v18, 0.0 }
  0x9f   :  { %v268_v25 = vsel %vm256_vm3, %v250_v18, %v262_v22  ;;  %v278_v22 = vld [vmem:[%s1139_s5 + $0x20] sm:$0xff] }
  0xa0   :  { %v225_v23 = vpop.f32.mrf.mxu2  ;;  %v998_v35 = vmul.f32 %v274_v26, %v268_v25 }
  0xa1   :  { %v241_v24 = vadd.f32 %v225_v23, %v156_v21 }
  0xa2   :  { %v311_v43 = vrot.slane %v998_v35, 1  ;;  %v417_v45 = vrot.slane %v998_v35, 2 }
  0xa3   :  { %v251_v27 = vadd.f32 %v982_v15, %v241_v24  ;;  %v111_v28 = vpop.f32.mrf.mxu0  ;;  %v158_v29 = vpop.f32.mrf.mxu1 }
  0xa4   :  { %v159_v33 = vadd.f32 %v158_v29, %v111_v28 }
  0xa5   :  { %vm257_vm4 = vcmp.gt.f32.partialorder %v251_v27, 0.0  ;;  %v263_v31 = vmul.f32 0.2, %v251_v27 }
  0xa7   :  { %v269_v36 = vsel %vm257_vm4, %v251_v27, %v263_v31 }
  0xa8   :  { %v1003_v38 = vmul.f32 %v275_v32, %v269_v36  ;;  %v228_v39 = vpop.f32.mrf.mxu2 }
  0xa9   :  { %v242_v41 = vadd.f32 %v228_v39, %v159_v33 }
  0xaa   :  { %v312_v44 = vrot.slane %v1003_v38, 1  ;;  %v418_v46 = vrot.slane %v1003_v38, 2 }
  0xab   :  { %v252_v47 = vadd.f32 %v982_v15, %v242_v41  ;;  %v114_v48 = vpop.f32.mrf.mxu0  ;;  %v161_v49 = vpop.f32.mrf.mxu1 }
  0xac   :  { %v313_v50 = vsel %vm63_vm1, %v311_v43, %v312_v44  ;;  %v419_v51 = vsel %vm181_vm0, %v417_v45, %v418_v46  ;;  %v162_v54 = vadd.f32 %v161_v49, %v114_v48  ;;  %v515_v43 = vld [vmem:[%s1140_s6 + $0x70] sm:$0xff]  ;;  %v509_v48 = vld [vmem:[%s1140_s6 + $0x40] sm:$0xff]  ;;  %v508_v49 = vld [vmem:[%s1140_s6 + $0x38] sm:$0xff] }
  0xad   :  { %vm258_vm6 = vcmp.gt.f32.partialorder %v252_v47, 0.0  ;;  %v264_v52 = vmul.f32 0.2, %v252_v47  ;;  %686 = vmatmul.msk.f32.vlgmr.msra.gmra.mxu3 %vm322_vm5, %v313_v50  ;;  %705 = vmatmul.msk.f32.vlgmr.msrb.gmra.mxu0 %vm322_vm5, %v419_v51  ;;  %v511_v45 = vld [vmem:[%s1140_s6 + $0x50] sm:$0xff]  ;;  %v506_v51 = vld [vmem:[%s1140_s6 + $0x28] sm:$0xff] }
  0xae   :  { %518 = vmatpush.msrb.mxu1 %v515_v43  ;;  %v507_v50 = vld [vmem:[%s1140_s6 + $0x30] sm:$0xff] }
  0xaf   :  { %v270_v57 = vsel %vm258_vm6, %v252_v47, %v264_v52 }
  0xb0   :  { %v282_v59 = vmul.f32 %v276_v53, %v270_v57  ;;  %v231_v60 = vpop.f32.mrf.mxu2  ;;  %v505_v53 = vld [vmem:[%s1140_s6 + $0x20] sm:$0xff] }
  0xb1   :  { %v243_v61 = vadd.f32 %v231_v60, %v162_v54  ;;  %v504_v54 = vld [vmem:[%s1140_s6 + $0x18] sm:$0xff] }
  0xb2   :  { %v314_v63 = vrot.slane %v282_v59, 1  ;;  %v420_v0 = vrot.slane %v282_v59, 2 }
  0xb3   :  { %v253_v1 = vadd.f32 %v982_v15, %v243_v61  ;;  %v117_v2 = vpop.f32.mrf.mxu0  ;;  %v164_v3 = vpop.f32.mrf.mxu1 }
  0xb4   :  { %v315_v4 = vsel %vm63_vm1, %v312_v44, %v314_v63  ;;  %v421_v5 = vsel %vm181_vm0, %v418_v46, %v420_v0  ;;  %v165_v8 = vadd.f32 %v164_v3, %v117_v2  ;;  %v512_v44 = vld [vmem:[%s1140_s6 + $0x58] sm:$0xff]  ;;  %v510_v46 = vld [vmem:[%s1140_s6 + $0x48] sm:$0xff] }
  0xb5   :  { %vm259_vm7 = vcmp.gt.f32.partialorder %v253_v1, 0.0  ;;  %v265_v6 = vmul.f32 0.2, %v253_v1  ;;  %687 = vmatmul.msk.f32.gmra.mxu3 %vm322_vm5, %v315_v4  ;;  %706 = vmatmul.msk.f32.gmra.mxu0 %vm322_vm5, %v421_v5 }
  0xb7   :  { %v271_v9 = vsel %vm259_vm7, %v253_v1, %v265_v6 }
  0xb8   :  { %v283_v10 = vmul.f32 %v277_v7, %v271_v9  ;;  %v234_v11 = vpop.f32.mrf.mxu2 }
  0xb9   :  { %v244_v12 = vadd.f32 %v234_v11, %v165_v8 }
  0xba   :  { %v316_v13 = vrot.slane %v283_v10, 1  ;;  %v422_v14 = vrot.slane %v283_v10, 2 }
  0xbb   :  { %v254_v16 = vadd.f32 %v982_v15, %v244_v12  ;;  %v120_v17 = vpop.f32.mrf.mxu0  ;;  %v167_v18 = vpop.f32.mrf.mxu1 }
  0xbc   :  { %v317_v19 = vsel %vm63_vm1, %v314_v63, %v316_v13  ;;  %v423_v20 = vsel %vm181_vm0, %v420_v0, %v422_v14  ;;  %v168_v23 = vadd.f32 %v167_v18, %v120_v17  ;;  %v715_v0 = vld [vmem:[%s1138_s4] ss:$0 sm:$0xff] }
  0xbd   :  { %vm260_vm8 = vcmp.gt.f32.partialorder %v254_v16, 0.0  ;;  %v266_v21 = vmul.f32 0.2, %v254_v16  ;;  %688 = vmatmul.msk.f32.gmra.mxu3 %vm322_vm5, %v317_v19  ;;  %707 = vmatmul.msk.f32.gmra.mxu0 %vm322_vm5, %v423_v20 }
  0xbf   :  { %v272_v24 = vsel %vm260_vm8, %v254_v16, %v266_v21 }
  0xc0   :  { %v284_v25 = vmul.f32 %v278_v22, %v272_v24  ;;  %v237_v26 = vpop.f32.mrf.mxu2 }
  0xc1   :  { %v245_v27 = vadd.f32 %v237_v26, %v168_v23 }
  0xc2   :  { %v318_v28 = vrot.slane %v284_v25, 1  ;;  %v424_v29 = vrot.slane %v284_v25, 2 }
  0xc3   :  { %v255_v30 = vadd.f32 %v982_v15, %v245_v27 }
  0xc4   :  { %v319_v31 = vsel %vm63_vm1, %v316_v13, %v318_v28  ;;  %v425_v32 = vsel %vm181_vm0, %v422_v14, %v424_v29 }
  0xc5   :  { %vm261_vm9 = vcmp.gt.f32.partialorder %v255_v30, 0.0  ;;  %v267_v33 = vmul.f32 0.2, %v255_v30  ;;  %689 = vmatmul.msk.f32.gmra.mxu3 %vm322_vm5, %v319_v31  ;;  %708 = vmatmul.msk.f32.gmra.mxu0 %vm322_vm5, %v425_v32 }
  0xc7   :  { %v273_v36 = vsel %vm261_vm9, %v255_v30, %v267_v33 }
  0xc8   :  { %v285_v37 = vmul.f32 %v279_v34, %v273_v36 }
  0xca   :  { %v320_v39 = vrot.slane %v285_v37, 1  ;;  %v426_v40 = vrot.slane %v285_v37, 2 }
  0xcc   :  { %v321_v15 = vsel %vm63_vm1, %v318_v28, %v320_v39  ;;  %v427_v41 = vsel %vm181_vm0, %v424_v29, %v426_v40  ;;  %vm579_vm0 = vcmask 517120   ;;  %vm588_vm1 = vcmask 1041920  }
  0xcd   :  { %690 = vmatmul.msk.f32.gmra.mxu3 %vm322_vm5, %v321_v15  ;;  %709 = vmatmul.msk.f32.gmra.mxu0 %vm322_vm5, %v427_v41  ;;  %v499_v15 = vld [vmem:[%s1141_s7] sm:$0xff]  ;;  %v500_v41 = vld [vmem:[%s1141_s7 + $0x8] sm:$0xff]  ;;  %s743_s7 = smov [#allocation2]  }
  0xce   :  { %s628_s11 = sshll.u32 %s743_s7, 4  ;;  %s629_s11 = int_to_ptr.vmem [resolvable:$true] %s628_s11 }
  0xd5   :  { %691 = vmatmul.msk.f32.vlgmr.msrb.gmra.mxu3 %vm322_vm5, %v998_v35  ;;  %v514_v35 = vld [vmem:[%s1140_s6 + $0x68] sm:$0xff] }
  0xd6   :  { %519 = vmatpush.msrb.mxu1 %v514_v35 }
  0xdd   :  { %692 = vmatmul.msk.f32.gmra.mxu3 %vm322_vm5, %v1003_v38  ;;  %v513_v38 = vld [vmem:[%s1140_s6 + $0x60] sm:$0xff] }
  0xde   :  { %520 = vmatpush.msrb.mxu1 %v513_v38 }
  0xe0   :  { %521 = vmatpush.msrb.mxu1 %v512_v44 }
  0xe2   :  { %522 = vmatpush.msrb.mxu1 %v511_v45 }
  0xe4   :  { %523 = vmatpush.msrb.mxu1 %v510_v46 }
  0xe5   :  { %693 = vmatmul.msk.f32.gmra.mxu3 %vm322_vm5, %v282_v59 }
  0xe6   :  { %524 = vmatpush.msrb.mxu1 %v509_v48 }
  0xe8   :  { %525 = vmatpush.msrb.mxu1 %v508_v49 }
  0xea   :  { %526 = vmatpush.msrb.mxu1 %v507_v50 }
  0xec   :  { %527 = vmatpush.msrb.mxu1 %v506_v51 }
  0xed   :  { %694 = vmatmul.msk.f32.gmra.mxu3 %vm322_vm5, %v283_v10 }
  0xee   :  { %528 = vmatpush.msrb.mxu1 %v505_v53 }
  0xf0   :  { %529 = vmatpush.msrb.mxu1 %v504_v54 }
  0xf2   :  { %530 = vmatpush.msrb.mxu1 %v503_v55 }
  0xf4   :  { %531 = vmatpush.msrb.mxu1 %v502_v56 }
  0xf5   :  { %695 = vmatmul.msk.f32.gmra.mxu3 %vm322_vm5, %v284_v25 }
  0xf6   :  { %532 = vmatpush.msrb.mxu1 %v501_v58 }
 0x12a   :  { %v455_v61 = vpop.f32.mrf.mxu0 }
 0x130   :  { %v350_v47 = vpop.f32.mrf.mxu3 }
 0x132   :  { %v458_v2 = vpop.f32.mrf.mxu0 }
 0x138   :  { %v353_v52 = vpop.f32.mrf.mxu3 }
 0x13a   :  { %v461_v10 = vpop.f32.mrf.mxu0 }
 0x140   :  { %v356_v57 = vpop.f32.mrf.mxu3 }
 0x142   :  { %v464_v19 = vpop.f32.mrf.mxu0 }
 0x148   :  { %v359_v59 = vpop.f32.mrf.mxu3 }
 0x14a   :  { %v467_v29 = vpop.f32.mrf.mxu0 }
 0x150   :  { %v362_v60 = vpop.f32.mrf.mxu3 }
 0x158   :  { %v392_v62 = vpop.f32.mrf.mxu3 }
 0x159   :  { %v393_v63 = vadd.f32 %v392_v62, %v350_v47 }
 0x15b   :  { %v470_v1 = vadd.f32 %v455_v61, %v393_v63 }
 0x15d   :  { %v479_v3 = vadd.f32 %v715_v0, %v470_v1 }
 0x15f   :  { %vm484_vm10 = vcmp.gt.f32.partialorder %v479_v3, 0.0  ;;  %v489_v4 = vmul.f32 0.2, %v479_v3 }
 0x160   :  { %v395_v5 = vpop.f32.mrf.mxu3 }
 0x161   :  { %v396_v6 = vadd.f32 %v395_v5, %v353_v52  ;;  %v494_v7 = vsel %vm484_vm10, %v479_v3, %v489_v4 }
 0x162   :  { %533 = vmatmul.f32.vlgmr.msrb.gmra.mxu1 %v494_v7 }
 0x163   :  { %v471_v8 = vadd.f32 %v458_v2, %v396_v6 }
 0x165   :  { %v480_v9 = vadd.f32 %v715_v0, %v471_v8 }
 0x167   :  { %vm485_vm11 = vcmp.gt.f32.partialorder %v480_v9, 0.0  ;;  %v490_v11 = vmul.f32 0.2, %v480_v9 }
 0x168   :  { %v398_v12 = vpop.f32.mrf.mxu3 }
 0x169   :  { %v399_v13 = vadd.f32 %v398_v12, %v356_v57  ;;  %v495_v14 = vsel %vm485_vm11, %v480_v9, %v490_v11 }
 0x16a   :  { %536 = vmatmul.f32.gmra.mxu1 %v495_v14 }
 0x16b   :  { %v472_v16 = vadd.f32 %v461_v10, %v399_v13 }
 0x16d   :  { %v481_v17 = vadd.f32 %v715_v0, %v472_v16 }
 0x16f   :  { %vm486_vm12 = vcmp.gt.f32.partialorder %v481_v17, 0.0  ;;  %v491_v18 = vmul.f32 0.2, %v481_v17 }
 0x170   :  { %v401_v20 = vpop.f32.mrf.mxu3 }
 0x171   :  { %v402_v21 = vadd.f32 %v401_v20, %v359_v59  ;;  %v496_v22 = vsel %vm486_vm12, %v481_v17, %v491_v18 }
 0x172   :  { %539 = vmatmul.f32.gmra.mxu1 %v496_v22 }
 0x173   :  { %v473_v23 = vadd.f32 %v464_v19, %v402_v21 }
 0x175   :  { %v482_v24 = vadd.f32 %v715_v0, %v473_v23 }
 0x177   :  { %vm487_vm13 = vcmp.gt.f32.partialorder %v482_v24, 0.0  ;;  %v492_v25 = vmul.f32 0.2, %v482_v24 }
 0x178   :  { %v404_v26 = vpop.f32.mrf.mxu3 }
 0x179   :  { %v405_v27 = vadd.f32 %v404_v26, %v362_v60  ;;  %v497_v28 = vsel %vm487_vm13, %v482_v24, %v492_v25 }
 0x17a   :  { %542 = vmatmul.f32.gmra.mxu1 %v497_v28 }
 0x17b   :  { %v474_v30 = vadd.f32 %v467_v29, %v405_v27 }
 0x17d   :  { %v483_v31 = vadd.f32 %v715_v0, %v474_v30 }
 0x17f   :  { %vm488_vm14 = vcmp.gt.f32.partialorder %v483_v31, 0.0  ;;  %v493_v32 = vmul.f32 0.2, %v483_v31 }
 0x181   :  { %v498_v33 = vsel %vm488_vm14, %v483_v31, %v493_v32 }
 0x182   :  { %545 = vmatmul.f32.gmra.mxu1 %v498_v33 }
 0x1df   :  { %v534_v34 = vpop.f32.mrf.mxu1 }
 0x1e7   :  { %v537_v36 = vpop.f32.mrf.mxu1 }
 0x1ef   :  { %v540_v37 = vpop.f32.mrf.mxu1 }
 0x1f7   :  { %v543_v39 = vpop.f32.mrf.mxu1 }
 0x1ff   :  { %v546_v40 = vpop.f32.mrf.mxu1 }
 0x200   :  { %567 = vmatpush.msrb.mxu2 %v546_v40 }
 0x202   :  { %568 = vmatpush.msrb.mxu2 %v543_v39 }
 0x204   :  { %569 = vmatpush.msrb.mxu2 %v540_v37 }
 0x206   :  { %570 = vmatpush.msrb.mxu2 %v537_v36 }
 0x208   :  { %571 = vmatpush.msrb.mxu2 %v534_v34 }
 0x209   :  { %710 = vmatmul.msk.f32.vlgmr.msrb.gmra.mxu2 %vm549_vm15, %v499_v15 }
 0x211   :  { %711 = vmatmul.msk.f32.gmra.mxu2 %vm549_vm15, %v500_v41 }
 0x28c   :  { %v573_v42 = vpop.f32.mrf.mxu2 }
 0x28d   :  { %582 = vst.sshfl [vmem:[#allocation1] sm:$0xff pattern:$0x73625140] %v573_v42 }
 0x28e   :  { %580 = vst.msk [vmem:[#allocation2] sm:$0x3] %vm579_vm0, %v573_v42 }
 0x294   :  { %v584_v43 = vld [vmem:[#allocation1 + $0x1] ss:$4 sm:$0xff]  ;;  %v576_v35 = vpop.f32.mrf.mxu2 }
 0x295   :  { %590 = vst.sshfl [vmem:[#allocation1] sm:$0xff pattern:$0x73625140] %v573_v42  ;;  %585 = vrot.lane.b32.xlu0 %v584_v43, %s742_s10 }
 0x296   :  { %602 = vst.msk [vmem:[#allocation2 + $0x4] sm:$0x3] %vm579_vm0, %v576_v35 }
 0x29c   :  { %v592_v38 = vld [vmem:[#allocation1 + $0x2] ss:$4 sm:$0xff] }
 0x29d   :  { %595 = vst.sshfl [vmem:[#allocation1] sm:$0xff pattern:$0x73625140] %v573_v42 }
 0x29e   :  { %594 = vst.msk [vmem:[#allocation2 + $0x2] sm:$0x3] %vm579_vm0, %v592_v38 }
 0x2a4   :  { %v597_v44 = vld [vmem:[#allocation1 + $0x3] ss:$4 sm:$0xff] }
 0x2a5   :  { %598 = vrot.lane.b32.xlu0 %v597_v44, %s742_s10  ;;  %604 = vst.sshfl [vmem:[#allocation1] sm:$0xff pattern:$0x73625140] %v576_v35 }
 0x2ac   :  { %v606_v45 = vld [vmem:[#allocation1 + $0x1] ss:$4 sm:$0xff] }
 0x2ad   :  { %607 = vrot.lane.b32.xlu1 %v606_v45, %s742_s10  ;;  %611 = vst.sshfl [vmem:[#allocation1] sm:$0xff pattern:$0x73625140] %v576_v35 }
 0x2b4   :  { %v613_v46 = vld [vmem:[#allocation1 + $0x2] ss:$4 sm:$0xff] }
 0x2b5   :  { %616 = vst.sshfl [vmem:[#allocation1] sm:$0xff pattern:$0x73625140] %v576_v35 }
 0x2b6   :  { %615 = vst.msk [vmem:[#allocation2 + $0x6] sm:$0x3] %vm579_vm0, %v613_v46 }
 0x2bc   :  { %v618_v47 = vld [vmem:[#allocation1 + $0x3] ss:$4 sm:$0xff] }
 0x2bd   :  { %619 = vrot.lane.b32.xlu1 %v618_v47, %s742_s10 }
 0x307   :  { %v586_v48 = vpop.permute.xlu0 %585 }
 0x308   :  { %589 = vst.msk [vmem:[#allocation2] sm:$0x3] %vm588_vm1, %v586_v48 }
 0x317   :  { %v599_v49 = vpop.permute.xlu0 %598 }
 0x318   :  { %601 = vst.msk [vmem:[#allocation2 + $0x2] sm:$0x3] %vm588_vm1, %v599_v49 }
 0x31f   :  { %v608_v50 = vpop.permute.xlu1 %607 }
 0x320   :  { %610 = vst.msk [vmem:[#allocation2 + $0x4] sm:$0x3] %vm588_vm1, %v608_v50 }
 0x32f   :  { %v620_v51 = vpop.permute.xlu1 %619 }
 0x330   :  { %622 = vst.msk [vmem:[#allocation2 + $0x6] sm:$0x3] %vm588_vm1, %v620_v51 }
 0x331   :  { %633 = dma.vmem_to_hbm [thread:$0]  %s629_s11, 128, %s631_s14, [#allocation3]  }
 0x332   :  { %740 = dma.done.wait [#allocation3], 128  }
 0x333   :  { %741 = vsyncadd [#allocation3], 4294967168 }
 0x334   :  { %638 = vsyncpa [#allocation3], 1 }

</bundles_post_ra>
